<compile_context>
chip_gen: v5e
topology: v5e:2x2
jax: 0.10.0
libtpu: 0.0.40
codegen_flags: <defaults>
</compile_context>

<pallas_src>
import functools

import jax
import jax.numpy as jnp
from jax.experimental import pallas as pl
from jax.experimental.pallas import tpu as pltpu

LANE = 128


def _round_up(x, m):
    return (x + m - 1) // m * m


# ---------------------------------------------------------------------------
# Kernels A & C: row-parallel batched projection  out = x @ w + b
# ---------------------------------------------------------------------------
def _proj_kernel(x_ref, w_ref, b_ref, o_ref):
    o_ref[...] = (
        jnp.dot(x_ref[...], w_ref[...], preferred_element_type=jnp.float32)
        + b_ref[...]
    )


def batched_projection(x, w, b, *, tm=256):
    """x:(M,K) @ w:(K,N) + b:(1,N) -> (M,N); grid-parallel over row tiles."""
    M, K = x.shape
    N = w.shape[1]
    Mp = _round_up(M, 8)
    tm = min(tm, Mp)
    Mp = _round_up(Mp, tm)
    xp = jnp.pad(x, ((0, Mp - M), (0, 0)))

    out = pl.pallas_call(
        _proj_kernel,
        out_shape=jax.ShapeDtypeStruct((Mp, N), jnp.float32),
        grid_spec=pltpu.PrefetchScalarGridSpec(
            num_scalar_prefetch=0,
            grid=(Mp // tm,),
            in_specs=[
                pl.BlockSpec((tm, K), lambda i: (i, 0)),
                pl.BlockSpec((K, N), lambda i: (0, 0)),   # weights stay resident
                pl.BlockSpec((1, N), lambda i: (0, 0)),
            ],
            out_specs=pl.BlockSpec((tm, N), lambda i: (i, 0)),
        ),
        compiler_params=pltpu.CompilerParams(
            dimension_semantics=("parallel",)),           # shards across TCs on v7x
    )(xp, w, b)
    return out[:M]


# ---------------------------------------------------------------------------
# Kernel B: GRU recurrence. Input-side gates are precomputed, so only the
# (B,Hp) x (Hp,3Hp) matmul + VPU/EUP gate math sits on the serial path.
# ---------------------------------------------------------------------------
def _gru_recurrence_kernel(gi_ref, h0_ref, whh_ref, bhh_ref,
                           hall_ref, hfin_ref, h_scratch,
                           *, seq_len, t_chunk, hp):
    c = pl.program_id(0)

    @pl.when(c == 0)
    def _():
        h_scratch[...] = h0_ref[...]

    whh = whh_ref[...]
    bhh = bhh_ref[...]

    def step(i, h):
        t = c * t_chunk + i
        gi = gi_ref[i]                                          # (B, 3Hp)
        gh = jnp.dot(h, whh, preferred_element_type=jnp.float32) + bhh
        # PyTorch GRU gate layout [r, z, n]; each gate padded to hp (lane-aligned).
        i_r, i_z, i_n = gi[:, :hp], gi[:, hp:2 * hp], gi[:, 2 * hp:]
        h_r, h_z, h_n = gh[:, :hp], gh[:, hp:2 * hp], gh[:, 2 * hp:]
        r = jax.nn.sigmoid(i_r + h_r)
        z = jax.nn.sigmoid(i_z + h_z)
        n = jnp.tanh(i_n + r * h_n)
        h_new = (1.0 - z) * n + z * h
        h_new = jnp.where(t < seq_len, h_new, h)                # mask padded steps
        hall_ref[i] = h_new
        return h_new

    h_last = jax.lax.fori_loop(0, t_chunk, step, h_scratch[...], unroll=True)
    h_scratch[...] = h_last

    @pl.when(c == pl.num_programs(0) - 1)                       # write once
    def _():
        hfin_ref[...] = h_last


# ---------------------------------------------------------------------------
# Wrapper: embedding / context concat glue + 3 pallas_calls.
# ---------------------------------------------------------------------------
def seq2seq_decoder_forward(X_tokens, state, params, *, t_chunk=8):
    """X_tokens: (batch, seq) int32 token ids.
       state:    (1, batch, hidden)  -- GRU hidden state from the encoder.
       returns (output (batch, seq, vocab), new_state (1, batch, hidden))."""
    emb_w = params["embedding"]                        # (V, E)
    w_ih, w_hh = params["w_ih"], params["w_hh"]        # (E+H, 3H), (H, 3H)
    b_ih, b_hh = params["b_ih"], params["b_hh"]        # (1, 3H), (1, 3H)
    w_d, b_d = params["w_dense"], params["b_dense"]    # (H, V), (1, V)

    B, S = X_tokens.shape
    V, E = emb_w.shape
    H = w_hh.shape[0]
    In = E + H

    Hp = _round_up(H, LANE)
    Vp = _round_up(V, LANE)

    def pad_gate_cols(w):  # (..., 3H) -> (..., 3Hp), each gate padded to Hp
        r, z, n = w[..., :H], w[..., H:2 * H], w[..., 2 * H:]
        pad = [(0, 0)] * (w.ndim - 1) + [(0, Hp - H)]
        return jnp.concatenate(
            [jnp.pad(r, pad), jnp.pad(z, pad), jnp.pad(n, pad)], axis=-1)

    w_ih_p = pad_gate_cols(w_ih)                                  # (In, 3Hp)
    w_hh_p = pad_gate_cols(jnp.pad(w_hh, ((0, Hp - H), (0, 0))))  # (Hp, 3Hp)
    b_ih_p = pad_gate_cols(b_ih)                                  # (1, 3Hp)
    b_hh_p = pad_gate_cols(b_hh)                                  # (1, 3Hp)
    w_d_p = jnp.pad(w_d, ((0, Hp - H), (0, Vp - V)))              # (Hp, Vp)
    b_d_p = jnp.pad(b_d, ((0, 0), (0, Vp - V)))                   # (1, Vp)
    h0_p = jnp.pad(state[-1], ((0, 0), (0, Hp - H)))              # (B, Hp)

    # Glue: embedding lookup, seq-major, concat broadcast context (like torch).
    x_emb = jnp.transpose(jnp.take(emb_w, X_tokens, axis=0), (1, 0, 2))  # (S,B,E)
    context = jnp.broadcast_to(state[-1][None], (S, B, H))
    x_cat = jnp.concatenate([x_emb, context], axis=2)             # (S,B,In)

    # Kernel A: input projection for all timesteps at once (parallel).
    gi_all = batched_projection(x_cat.reshape(S * B, In), w_ih_p, b_ih_p)
    gi3 = gi_all.reshape(S, B, 3 * Hp)

    # Kernel B: sequential recurrence, t_chunk timesteps per grid iteration.
    T = min(t_chunk, S)
    Sp = _round_up(S, T)
    gi3 = jnp.pad(gi3, ((0, Sp - S), (0, 0), (0, 0)))

    kern = functools.partial(_gru_recurrence_kernel,
                             seq_len=S, t_chunk=T, hp=Hp)
    h_all, h_fin = pl.pallas_call(
        kern,
        out_shape=(
            jax.ShapeDtypeStruct((Sp, B, Hp), jnp.float32),
            jax.ShapeDtypeStruct((B, Hp), jnp.float32),
        ),
        grid_spec=pltpu.PrefetchScalarGridSpec(
            num_scalar_prefetch=0,
            grid=(Sp // T,),
            in_specs=[
                pl.BlockSpec((T, B, 3 * Hp), lambda c: (c, 0, 0)),  # gates chunk
                pl.BlockSpec((B, Hp), lambda c: (0, 0)),            # h0
                pl.BlockSpec((Hp, 3 * Hp), lambda c: (0, 0)),       # w_hh
                pl.BlockSpec((1, 3 * Hp), lambda c: (0, 0)),        # b_hh
            ],
            out_specs=[
                pl.BlockSpec((T, B, Hp), lambda c: (c, 0, 0)),      # hidden per step
                pl.BlockSpec((B, Hp), lambda c: (0, 0)),            # final hidden
            ],
            scratch_shapes=[pltpu.VMEM((B, Hp), jnp.float32)],
        ),
        compiler_params=pltpu.CompilerParams(
            dimension_semantics=("arbitrary",)),                     # true recurrence
    )(gi3, h0_p, w_hh_p, b_hh_p)

    # Kernel C: output projection for all timesteps at once (parallel, lane-dense V).
    logits_p = batched_projection(h_all[:S].reshape(S * B, Hp), w_d_p, b_d_p)
    logits = logits_p.reshape(S, B, Vp)[:, :, :V]

    output = jnp.transpose(logits, (1, 0, 2))        # (B, S, V), like .permute(1,0,2)
    new_state = h_fin[:, :H][None]                   # (1, B, H)
    return output, new_state


# ---------------------------------------------------------------------------
# Pure-JAX reference (mirrors PyTorch Seq2SeqDecoder.forward).
# ---------------------------------------------------------------------------
def reference_forward(X_tokens, state, params):
    emb_w = params["embedding"]
    w_ih, w_hh = params["w_ih"], params["w_hh"]
    b_ih, b_hh = params["b_ih"], params["b_hh"]
    w_d, b_d = params["w_dense"], params["b_dense"]
    H = w_hh.shape[0]

    B, S = X_tokens.shape
    x_emb = jnp.transpose(jnp.take(emb_w, X_tokens, axis=0), (1, 0, 2))  # (S,B,E)
    context = jnp.broadcast_to(state[-1][None], (S, B, H))
    x_cat = jnp.concatenate([x_emb, context], axis=2)

    def step(h, x):
        gi = x @ w_ih + b_ih
        gh = h @ w_hh + b_hh
        i_r, i_z, i_n = gi[:, :H], gi[:, H:2 * H], gi[:, 2 * H:]
        h_r, h_z, h_n = gh[:, :H], gh[:, H:2 * H], gh[:, 2 * H:]
        r = jax.nn.sigmoid(i_r + h_r)
        z = jax.nn.sigmoid(i_z + h_z)
        n = jnp.tanh(i_n + r * h_n)
        h_new = (1.0 - z) * n + z * h
        return h_new, h_new @ w_d + b_d

    h_final, outs = jax.lax.scan(step, state[-1], x_cat)
    return jnp.transpose(outs, (1, 0, 2)), h_final[None]


if __name__ == "__main__":
    # Small, deterministic config.
    batch, seq = 2, 8
    vocab, embed, hidden = 32, 16, 32

    key = jax.random.PRNGKey(0)
    ks = jax.random.split(key, 9)
    scale = 0.1
    params = {
        "embedding": scale * jax.random.normal(ks[0], (vocab, embed), jnp.float32),
        "w_ih": scale * jax.random.normal(ks[1], (embed + hidden, 3 * hidden), jnp.float32),
        "w_hh": scale * jax.random.normal(ks[2], (hidden, 3 * hidden), jnp.float32),
        "b_ih": scale * jax.random.normal(ks[3], (1, 3 * hidden), jnp.float32),
        "b_hh": scale * jax.random.normal(ks[4], (1, 3 * hidden), jnp.float32),
        "w_dense": scale * jax.random.normal(ks[5], (hidden, vocab), jnp.float32),
        "b_dense": scale * jax.random.normal(ks[6], (1, vocab), jnp.float32),
    }
    X_tokens = jax.random.randint(ks[7], (batch, seq), 0, vocab, jnp.int32)
    enc_state = scale * jax.random.normal(ks[8], (1, batch, hidden), jnp.float32)

    out, new_state = seq2seq_decoder_forward(X_tokens, enc_state, params)
    out = jax.block_until_ready(out)
    new_state = jax.block_until_ready(new_state)

    ref_out, ref_state = reference_forward(X_tokens, enc_state, params)
    assert out.shape == (batch, seq, vocab)
    assert new_state.shape == (1, batch, hidden)
    assert jnp.allclose(out, ref_out, atol=1e-5, rtol=1e-5)
    assert jnp.allclose(new_state, ref_state, atol=1e-5, rtol=1e-5)

    print("KERNEL_OK")
</pallas_src>

<mosaic_0001>
module attributes {stable_mosaic.version = 11 : i64} {
  func.func @_proj_kernel(%arg0: i32, %arg1: memref<16x48xf32, #tpu.memory_space<vmem>>, %arg2: memref<48x384xf32, #tpu.memory_space<vmem>>, %arg3: memref<1x384xf32, #tpu.memory_space<vmem>>, %arg4: memref<16x384xf32, #tpu.memory_space<vmem>>) attributes {dimension_semantics = [#tpu.dimension_semantics<parallel>], iteration_bounds = array<i64: 1>, scalar_prefetch = 0 : i64, scratch_operands = 0 : i64, tpu.core_type = #tpu.core_type<tc>, window_params = [{transform_indices = @transform_0, window_bounds = array<i64: 16, 48>}, {pipeline_mode = #tpu.pipeline_mode<synchronous>, transform_indices = @transform_1, window_bounds = array<i64: 48, 384>}, {pipeline_mode = #tpu.pipeline_mode<synchronous>, transform_indices = @transform_2, window_bounds = array<i64: 1, 384>}, {transform_indices = @transform_3, window_bounds = array<i64: 16, 384>}]} {
    %c0 = arith.constant 0 : index
    %c0_0 = arith.constant 0 : index
    %0 = vector.load %arg1[%c0, %c0_0] : memref<16x48xf32, #tpu.memory_space<vmem>>, vector<16x48xf32>
    %c0_1 = arith.constant 0 : index
    %c0_2 = arith.constant 0 : index
    %1 = vector.load %arg2[%c0_1, %c0_2] : memref<48x384xf32, #tpu.memory_space<vmem>>, vector<48x384xf32>
    %cst = arith.constant dense<0.000000e+00> : vector<16x384xf32>
    %2 = tpu.matmul %0, %1, %cst {dimension_numbers = #tpu.dot_dimension_numbers<[1], [0], [0], [1], [0, 0, 1, 1], [], []>} : vector<16x48xf32>, vector<48x384xf32>, vector<16x384xf32> -> vector<16x384xf32>
    %c0_3 = arith.constant 0 : index
    %c0_4 = arith.constant 0 : index
    %3 = vector.load %arg3[%c0_3, %c0_4] : memref<1x384xf32, #tpu.memory_space<vmem>>, vector<1x384xf32>
    %4 = vector.broadcast %3 : vector<1x384xf32> to vector<16x384xf32>
    %5 = arith.addf %2, %4 : vector<16x384xf32>
    %c0_5 = arith.constant 0 : index
    %c0_6 = arith.constant 0 : index
    %6 = vector.load %arg4[%c0_5, %c0_6] : memref<16x384xf32, #tpu.memory_space<vmem>>, vector<16x384xf32>
    tpu.vector_store %arg4[%c0_5, %c0_6], %5 {strides = array<i32>} : memref<16x384xf32, #tpu.memory_space<vmem>>, vector<16x384xf32>,
    return
  }
  func.func @transform_0(%arg0: i32) -> (i32, i32) {
    %c0_i32 = arith.constant 0 : i32
    %c0_i32_0 = arith.constant 0 : i32
    return %arg0, %c0_i32 : i32, i32
  }
  func.func @transform_1(%arg0: i32) -> (i32, i32) {
    %c0_i32 = arith.constant 0 : i32
    %c0_i32_0 = arith.constant 0 : i32
    %c0_i32_1 = arith.constant 0 : i32
    return %c0_i32, %c0_i32_0 : i32, i32
  }
  func.func @transform_2(%arg0: i32) -> (i32, i32) {
    %c0_i32 = arith.constant 0 : i32
    %c0_i32_0 = arith.constant 0 : i32
    %c0_i32_1 = arith.constant 0 : i32
    return %c0_i32, %c0_i32_0 : i32, i32
  }
  func.func @transform_3(%arg0: i32) -> (i32, i32) {
    %c0_i32 = arith.constant 0 : i32
    %c0_i32_0 = arith.constant 0 : i32
    return %arg0, %c0_i32 : i32, i32
  }
}

</mosaic_0001>

<bundles_post_ra>
// kernel: tpu_custom_call.1
= control target key start
LH: loop header
LB: loop body
LE: loop exit
PB: predicated region body
PF: predicated region fallthrough
CT: control target
= control target key end

     0   :  { %8 = vsyncpa [#allocation3], 0  ;;  %s364_s0 = inlined_call_operand.hbm [shape: f32[16,48], index: 0, kind: input, shape index: {}]   ;;  %s365_s1 = inlined_call_operand.hbm [shape: f32[48,384], index: 1, kind: input, shape index: {}]   ;;  %s366_s2 = inlined_call_operand.hbm [shape: f32[1,384], index: 2, kind: input, shape index: {}]   ;;  %s367_s3 = inlined_call_operand.hbm [shape: f32[16,384], index: 3, kind: output, shape index: {}]  }
   0x1   :  { %9 = vsyncpa [#allocation6], 0  ;;  %s28_s14 = sshll.u32 %s365_s1, 4  ;;  %s29_s14 = int_to_ptr.hbm [resolvable:$true] %s28_s14 }
   0x2   :  { %10 = vsyncpa [#allocation4], 0  ;;  %s312_s15 = smov [#allocation5]   ;;  %s15_s19 = sshll.u32 %s364_s0, 4  ;;  %s16_s19 = int_to_ptr.hbm [resolvable:$true] %s15_s19 }
   0x3   :  { %s30_s16 = sshll.u32 %s312_s15, 4  ;;  %s313_s20 = smov 384   ;;  %s31_s16 = int_to_ptr.vmem [resolvable:$true] %s30_s16 }
   0x4   :  { %s314_s21 = smov 24   ;;  %s315_s22 = smov [#allocation2]  }
   0x5   :  { %36 = dma.hbm_to_vmem [thread:$0]  %s29_s14, 2304, %s31_s16, [#allocation6], %s313_s20, %s313_s20, %s314_s21  }
   0x6   :  { %s17_s23 = sshll.u32 %s315_s22, 4  ;;  %s316_s1 = smov 128   ;;  %s18_s23 = int_to_ptr.vmem [resolvable:$true] %s17_s23 }
   0x7   :  { %s317_s24 = smov 8   ;;  %s42_s27 = sshll.u32 %s366_s2, 4  ;;  %s43_s27 = int_to_ptr.hbm [resolvable:$true] %s42_s27 }
   0x8   :  { %23 = dma.hbm_to_vmem [thread:$0]  %s16_s19, 256, %s18_s23, [#allocation3], %s316_s1, %s316_s1, %s317_s24  }
   0x9   :  { %s318_s28 = smov [#allocation7]  }
   0xa   :  { %s44_s0 = sshll.u32 %s318_s28, 4  ;;  %s45_s0 = int_to_ptr.vmem [resolvable:$true] %s44_s0 }
   0xb   :  { %47 = dma.hbm_to_vmem [thread:$0]  %s43_s27, 48, %s45_s0, [#allocation6]  }
   0xc   :  { %306 = dma.done.wait [#allocation3], 256  }
   0xd   :  { %307 = vsyncadd [#allocation3], 4294967040 }
   0xe   :  { %308 = dma.done.wait [#allocation6], 2352  }
   0xf   :  { %309 = vsyncadd [#allocation6], 4294964944  ;;  %v79_v0 = vld [vmem:[#allocation5 + $0x88] sm:$0xff]  ;;  %v76_v1 = vld [vmem:[#allocation5 + $0x70] sm:$0xff]  ;;  %vm88_vm0 = vcmask 392192   ;;  %s319_s2 = smov [#allocation8]  }
  0x10   :  { %151 = vmatpush.msra.mxu2 %v79_v0  ;;  %v78_v2 = vld [vmem:[#allocation5 + $0x80] sm:$0xff]  ;;  %v77_v3 = vld [vmem:[#allocation5 + $0x78] sm:$0xff]  ;;  %v75_v5 = vld [vmem:[#allocation5 + $0x68] sm:$0xff]  ;;  %s174_s29 = sshll.u32 %s319_s2, 4  ;;  %s176_s5 = sshll.u32 %s367_s3, 4  ;;  %s175_s29 = int_to_ptr.vmem [resolvable:$true] %s174_s29  ;;  %s177_s5 = int_to_ptr.hbm [resolvable:$true] %s176_s5 }
  0x11   :  { %v73_v4 = vld [vmem:[#allocation5 + $0x58] sm:$0xff]  ;;  %128 = vmatpush.msra.mxu1 %v78_v2  ;;  %196 = vmatpush.msra.mxu3 %v77_v3  ;;  %v74_v6 = vld [vmem:[#allocation5 + $0x60] sm:$0xff]  ;;  %v72_v7 = vld [vmem:[#allocation5 + $0x50] sm:$0xff] }
  0x12   :  { %152 = vmatpush.msra.mxu2 %v76_v1  ;;  %105 = vmatpush.msra.mxu0 %v77_v3  ;;  %v70_v8 = vld [vmem:[#allocation5 + $0x40] sm:$0xff]  ;;  %v71_v9 = vld [vmem:[#allocation5 + $0x48] sm:$0xff]  ;;  %v69_v10 = vld [vmem:[#allocation5 + $0x38] sm:$0xff] }
  0x13   :  { %129 = vmatpush.msra.mxu1 %v75_v5  ;;  %197 = vmatpush.msra.mxu3 %v74_v6  ;;  %v68_v11 = vld [vmem:[#allocation5 + $0x30] sm:$0xff]  ;;  %v67_v12 = vld [vmem:[#allocation5 + $0x28] sm:$0xff]  ;;  %v66_v13 = vld [vmem:[#allocation5 + $0x20] sm:$0xff] }
  0x14   :  { %153 = vmatpush.msra.mxu2 %v73_v4  ;;  %106 = vmatpush.msra.mxu0 %v74_v6  ;;  %v65_v14 = vld [vmem:[#allocation5 + $0x18] sm:$0xff]  ;;  %v64_v15 = vld [vmem:[#allocation5 + $0x10] sm:$0xff]  ;;  %v63_v17 = vld [vmem:[#allocation5 + $0x8] sm:$0xff] }
  0x15   :  { %130 = vmatpush.msra.mxu1 %v72_v7  ;;  %198 = vmatpush.msra.mxu3 %v71_v9  ;;  %v60_v16 = vld [vmem:[#allocation2] sm:$0xff]  ;;  %v62_v18 = vld [vmem:[#allocation5] sm:$0xff]  ;;  %v61_v19 = vld [vmem:[#allocation2 + $0x8] sm:$0xff] }
  0x16   :  { %154 = vmatpush.msra.mxu2 %v70_v8  ;;  %107 = vmatpush.msra.mxu0 %v71_v9  ;;  %v80_v20 = vld [vmem:[#allocation7] sm:$0x7] }
  0x17   :  { %131 = vmatpush.msra.mxu1 %v69_v10  ;;  %199 = vmatpush.msra.mxu3 %v68_v11  ;;  %v83_v21 = vperm.slane %v80_v20, 1  ;;  %v82_v22 = vperm.slane %v80_v20, 0  ;;  %v84_v25 = vperm.slane %v80_v20, 2 }
  0x18   :  { %155 = vmatpush.msra.mxu2 %v67_v12  ;;  %108 = vmatpush.msra.mxu0 %v68_v11 }
  0x19   :  { %132 = vmatpush.msra.mxu1 %v66_v13  ;;  %200 = vmatpush.msra.mxu3 %v65_v14 }
  0x1a   :  { %156 = vmatpush.msra.mxu2 %v64_v15  ;;  %109 = vmatpush.msra.mxu0 %v65_v14 }
  0x1b   :  { %194 = vmatmul.msk.f32.vlgmr.msra.gmra.mxu2 %vm88_vm0, %v60_v16  ;;  %133 = vmatpush.msra.mxu1 %v63_v17 }
  0x1c   :  { %192 = vmatmul.msk.f32.vlgmr.msra.gmra.mxu1 %vm88_vm0, %v60_v16  ;;  %201 = vmatpush.msra.mxu3 %v62_v18 }
  0x1d   :  { %191 = vmatmul.msk.f32.vlgmr.msra.gmra.mxu3 %vm88_vm0, %v61_v19  ;;  %110 = vmatpush.msra.mxu0 %v62_v18 }
  0x1e   :  { %190 = vmatmul.msk.f32.vlgmr.msra.gmra.mxu0 %vm88_vm0, %v60_v16 }
  0x23   :  { %195 = vmatmul.msk.f32.gmra.mxu2 %vm88_vm0, %v61_v19 }
  0x24   :  { %193 = vmatmul.msk.f32.gmra.mxu1 %vm88_vm0, %v61_v19 }
  0x99   :  { %v135_v23 = vpop.f32.mrf.mxu1 }
  0x9a   :  { %v136_v24 = vadd.f32 %v135_v23, %v83_v21 }
  0x9b   :  { %v112_v26 = vpop.f32.mrf.mxu0 }
  0x9c   :  { %165 = vst [vmem:[#allocation8 + $0x8] sm:$0xff] %v136_v24  ;;  %v113_v27 = vadd.f32 %v112_v26, %v82_v22 }
  0x9e   :  { %v158_v28 = vpop.f32.mrf.mxu2  ;;  %164 = vst [vmem:[#allocation8] sm:$0xff] %v113_v27 }
  0x9f   :  { %v159_v29 = vadd.f32 %v158_v28, %v84_v25 }
  0xa0   :  { %v115_v30 = vpop.f32.mrf.mxu3 }
  0xa1   :  { %166 = vst [vmem:[#allocation8 + $0x10] sm:$0xff] %v159_v29  ;;  %v116_v31 = vadd.f32 %v115_v30, %v82_v22  ;;  %v138_v32 = vpop.f32.mrf.mxu1 }
  0xa2   :  { %v139_v33 = vadd.f32 %v138_v32, %v83_v21 }
  0xa3   :  { %167 = vst [vmem:[#allocation8 + $0x18] sm:$0xff] %v116_v31 }
  0xa4   :  { %168 = vst [vmem:[#allocation8 + $0x20] sm:$0xff] %v139_v33 }
  0xa6   :  { %v161_v34 = vpop.f32.mrf.mxu2 }
  0xa7   :  { %v162_v35 = vadd.f32 %v161_v34, %v84_v25 }
  0xa9   :  { %169 = vst [vmem:[#allocation8 + $0x28] sm:$0xff] %v162_v35 }
  0xaa   :  { %182 = dma.vmem_to_hbm [thread:$0]  %s175_s29, 768, %s177_s5, [#allocation4], %s313_s20, %s313_s20, %s314_s21  }
  0xab   :  { %310 = dma.done.wait [#allocation4], 768  }
  0xac   :  { %311 = vsyncadd [#allocation4], 4294966528 }
  0xad   :  { %187 = vsyncpa [#allocation3], 1 }
  0xae   :  { %188 = vsyncpa [#allocation6], 1 }
  0xaf   :  { %189 = vsyncpa [#allocation4], 1 }

</bundles_post_ra>
